<compile_context>
chip_gen: v7x
topology: tpu7x:2x2x1
jax: 0.10.0
libtpu: 0.0.40
codegen_flags: <defaults>
</compile_context>

<pallas_src>
import jax
import jax.numpy as jnp
from jax.experimental import pallas as pl
from jax.experimental.pallas import tpu as pltpu


def _round_up(x, m):
    return (x + m - 1) // m * m


# ----------------------------- Pallas kernel --------------------------------

def _layernorm_relu(h, gamma, beta, eps=1e-5):
    """LayerNorm over the feature (sublane) axis followed by ReLU.

    h: [features, batch_tile] (batch on lanes); gamma/beta: [features, 1].
    """
    mean = jnp.mean(h, axis=0, keepdims=True)
    var = jnp.mean(jnp.square(h - mean), axis=0, keepdims=True)
    h = (h - mean) * jax.lax.rsqrt(var + eps) * gamma + beta
    return jnp.maximum(h, 0.0)


def make_lincs_kernel(num_layers):
    """Fused kernel: embedding gather + concat + MLP, batch on the lane axis.

    Ref order:
      pert_idx [1,bt] i32, cell_idx [1,bt] i32, z_time [1,bt] f32,
      log_conc [1,bt] f32, pert_emb_t [pc,NP] f32, cell_emb_t [cc,NL] f32,
      <flat MLP params>, out [out_channels, bt] f32
    """

    def kernel(*refs):
        pidx_ref, cidx_ref, t_ref, lc_ref, pemb_ref, cemb_ref = refs[:6]
        o_ref = refs[-1]
        p = refs[6:-1]

        bt = pidx_ref.shape[-1]
        n_pert = pemb_ref.shape[-1]
        n_cell = cemb_ref.shape[-1]

        # ---- fused embedding lookup: one-hot @ table (exact row select) ----
        # TODO(synk): for very large vocabularies this should become a DMA
        #             gather; one-hot matmul is only sensible for small tables.
        onehot_p = (jax.lax.broadcasted_iota(jnp.int32, (n_pert, bt), 0)
                    == pidx_ref[...]).astype(jnp.float32)           # [NP, bt]
        onehot_c = (jax.lax.broadcasted_iota(jnp.int32, (n_cell, bt), 0)
                    == cidx_ref[...]).astype(jnp.float32)           # [NL, bt]
        z_pert = jnp.dot(pemb_ref[...], onehot_p,
                         preferred_element_type=jnp.float32)        # [pc, bt]
        z_cell = jnp.dot(cemb_ref[...], onehot_c,
                         preferred_element_type=jnp.float32)        # [cc, bt]

        # ---- layer 0: the torch.cat is folded into split weight blocks -----
        w0p, w0c, w0t, w0lc, b0 = (p[0][...], p[1][...], p[2][...],
                                   p[3][...], p[4][...])
        h = (jnp.dot(w0p, z_pert, preferred_element_type=jnp.float32)
             + jnp.dot(w0c, z_cell, preferred_element_type=jnp.float32)
             + w0t * t_ref[...] + w0lc * lc_ref[...] + b0)          # [H0, bt]
        idx = 5

        if num_layers > 1:
            h = _layernorm_relu(h, p[idx][...], p[idx + 1][...])
            idx += 2
            for _ in range(1, num_layers - 1):
                w, b = p[idx][...], p[idx + 1][...]
                g, be = p[idx + 2][...], p[idx + 3][...]
                idx += 4
                h = jnp.dot(w, h, preferred_element_type=jnp.float32) + b
                h = _layernorm_relu(h, g, be)
            w_last, b_last = p[idx][...], p[idx + 1][...]
            h = jnp.dot(w_last, h, preferred_element_type=jnp.float32) + b_last

        o_ref[...] = h.astype(o_ref.dtype)

    return kernel


def mlp_pallas(pidx2d, cidx2d, t2d, lc2d, pemb_t, cemb_t, mlp_params,
               num_layers, out_channels, bt):
    """Run the fused (gather + MLP) kernel over lane-aligned batch tiles."""
    b_pad = pidx2d.shape[1]
    assert b_pad % bt == 0
    grid = (b_pad // bt,)

    tile_map = lambda i: (0, i)
    full_map = lambda i: (0, 0)

    in_specs = [pl.BlockSpec((1, bt), tile_map)] * 4          # idx/idx/time/conc
    in_specs += [pl.BlockSpec(pemb_t.shape, full_map),        # tables resident
                 pl.BlockSpec(cemb_t.shape, full_map)]
    in_specs += [pl.BlockSpec(w.shape, full_map) for w in mlp_params]

    return pl.pallas_call(
        make_lincs_kernel(num_layers),
        out_shape=jax.ShapeDtypeStruct((out_channels, b_pad), jnp.float32),
        grid=grid,
        in_specs=in_specs,
        out_specs=pl.BlockSpec((out_channels, bt), tile_map),
        compiler_params=pltpu.CompilerParams(
            dimension_semantics=("parallel",)),
    )(pidx2d, cidx2d, t2d, lc2d, pemb_t, cemb_t, *mlp_params)


# ------------------------------- Model glue ---------------------------------

def lincs_emb_nn_forward(params, pert_idx, cell_idx, z_time, log_conc,
                         *, num_layers, batch_tile=512):
    """Forward pass.  `batch_tile` must be a multiple of 128 (lane-dense)."""
    assert batch_tile % 128 == 0
    B = pert_idx.shape[0]
    out_channels = params["mlp"][-1].shape[0]

    bt = min(batch_tile, _round_up(B, 128))
    b_pad = _round_up(B, bt)
    pad = b_pad - B

    def prep(x, dtype):
        x = x.astype(dtype)
        if pad:
            x = jnp.pad(x, (0, pad))
        return x.reshape(1, b_pad)

    pidx2d = prep(pert_idx, jnp.int32)
    cidx2d = prep(cell_idx, jnp.int32)
    t2d = prep(z_time, jnp.float32)
    lc2d = prep(log_conc, jnp.float32)

    out_t = mlp_pallas(pidx2d, cidx2d, t2d, lc2d,
                       params["pert_emb_t"], params["cell_emb_t"],
                       params["mlp"], num_layers, out_channels, bt)
    return out_t[:, :B].T                                     # [B, out_channels]


# ---------------------------- Parameter init --------------------------------

def xavier_normal(key, fan_in, fan_out, gain=1.0):
    # Returned in PyTorch nn.Linear layout: [out_features, in_features].
    std = gain * (2.0 / (fan_in + fan_out)) ** 0.5
    return std * jax.random.normal(key, (fan_out, fan_in), jnp.float32)


def init_params(key, num_lines, num_perts, cell_channels, pert_channels,
                hidden_channels, out_channels, num_layers):
    in_channels = cell_channels + pert_channels + 2
    keys = jax.random.split(key, 2 + num_layers)

    # Embedding tables stored transposed ([channels, num]) == Embedding.weight.T
    cell_emb_t = jax.random.normal(keys[0], (cell_channels, num_lines), jnp.float32)
    pert_emb_t = jax.random.normal(keys[1], (pert_channels, num_perts), jnp.float32)

    dims = [in_channels] + [hidden_channels] * (num_layers - 1) + [out_channels]
    flat = []
    for layer in range(num_layers):
        fi, fo = dims[layer], dims[layer + 1]
        w = xavier_normal(keys[2 + layer], fi, fo)            # [fo, fi]
        b = jnp.zeros((fo, 1), jnp.float32)
        if layer == 0:
            pc, cc = pert_channels, cell_channels
            # columns of the first weight follow the torch.cat order:
            # [pert | cell | time | conc]
            flat += [w[:, :pc], w[:, pc:pc + cc],
                     w[:, pc + cc:pc + cc + 1], w[:, pc + cc + 1:pc + cc + 2], b]
        else:
            flat += [w, b]
        if layer != num_layers - 1:
            flat += [jnp.ones((fo, 1), jnp.float32),          # LayerNorm gamma
                     jnp.zeros((fo, 1), jnp.float32)]         # LayerNorm beta
    return {"cell_emb_t": cell_emb_t, "pert_emb_t": pert_emb_t,
            "mlp": tuple(flat)}


# ---------------------------- Plain-JAX reference ---------------------------

def reference_forward(params, pert_idx, cell_idx, z_time, log_conc, num_layers):
    hp = jax.lax.Precision.HIGHEST
    p = params["mlp"]
    z_pert = params["pert_emb_t"].T[pert_idx]
    z_cell = params["cell_emb_t"].T[cell_idx]
    x = jnp.concatenate(
        [z_pert, z_cell, z_time[:, None], log_conc[:, None]], axis=1)

    def ln_relu(h, g, b, eps=1e-5):
        m = h.mean(axis=-1, keepdims=True)
        v = ((h - m) ** 2).mean(axis=-1, keepdims=True)
        return jnp.maximum((h - m) / jnp.sqrt(v + eps) * g + b, 0.0)

    w0 = jnp.concatenate(p[0:4], axis=1)                      # [H0, in_channels]
    h = jnp.dot(x, w0.T, precision=hp) + p[4][:, 0]
    idx = 5
    if num_layers > 1:
        h = ln_relu(h, p[idx][:, 0], p[idx + 1][:, 0]); idx += 2
        for _ in range(1, num_layers - 1):
            h = jnp.dot(h, p[idx].T, precision=hp) + p[idx + 1][:, 0]
            h = ln_relu(h, p[idx + 2][:, 0], p[idx + 3][:, 0]); idx += 4
        h = jnp.dot(h, p[idx].T, precision=hp) + p[idx + 1][:, 0]
    return h


# ---------------------------------- Main -------------------------------------

if __name__ == "__main__":
    num_lines = 10
    num_perts = 20
    cell_channels = 8
    pert_channels = 6
    hidden_channels = 32
    out_channels = 4
    num_layers = 3
    batch = 256          # 2 tiles of 128 -> grid=2 so both v7x TCs get work

    key = jax.random.PRNGKey(0)
    k_param, k_p, k_c, k_t, k_l = jax.random.split(key, 5)

    params = init_params(
        k_param, num_lines, num_perts, cell_channels, pert_channels,
        hidden_channels, out_channels, num_layers)

    pert_idx = jax.random.randint(k_p, (batch,), 0, num_perts)
    cell_idx = jax.random.randint(k_c, (batch,), 0, num_lines)
    z_time = jax.random.uniform(k_t, (batch,), jnp.float32)
    log_conc = jax.random.normal(k_l, (batch,), jnp.float32)

    out = lincs_emb_nn_forward(
        params, pert_idx, cell_idx, z_time, log_conc,
        num_layers=num_layers, batch_tile=128)
    out = jax.block_until_ready(out)

    assert out.shape == (batch, out_channels)
    assert out.dtype == jnp.float32

    ref = reference_forward(params, pert_idx, cell_idx, z_time, log_conc,
                            num_layers)
    err = float(jnp.max(jnp.abs(out - ref)))
    assert err < 1e-2, f"max abs error {err}"
    print("KERNEL_OK")
</pallas_src>

<mosaic_0001>
module attributes {stable_mosaic.version = 11 : i64} {
  func.func @kernel(%arg0: i32, %arg1: memref<1x128xi32, #tpu.memory_space<vmem>>, %arg2: memref<1x128xi32, #tpu.memory_space<vmem>>, %arg3: memref<1x128xf32, #tpu.memory_space<vmem>>, %arg4: memref<1x128xf32, #tpu.memory_space<vmem>>, %arg5: memref<6x20xf32, #tpu.memory_space<vmem>>, %arg6: memref<8x10xf32, #tpu.memory_space<vmem>>, %arg7: memref<32x6xf32, #tpu.memory_space<vmem>>, %arg8: memref<32x8xf32, #tpu.memory_space<vmem>>, %arg9: memref<32x1xf32, #tpu.memory_space<vmem>>, %arg10: memref<32x1xf32, #tpu.memory_space<vmem>>, %arg11: memref<32x1xf32, #tpu.memory_space<vmem>>, %arg12: memref<32x1xf32, #tpu.memory_space<vmem>>, %arg13: memref<32x1xf32, #tpu.memory_space<vmem>>, %arg14: memref<32x32xf32, #tpu.memory_space<vmem>>, %arg15: memref<32x1xf32, #tpu.memory_space<vmem>>, %arg16: memref<32x1xf32, #tpu.memory_space<vmem>>, %arg17: memref<32x1xf32, #tpu.memory_space<vmem>>, %arg18: memref<4x32xf32, #tpu.memory_space<vmem>>, %arg19: memref<4x1xf32, #tpu.memory_space<vmem>>, %arg20: memref<4x128xf32, #tpu.memory_space<vmem>>) attributes {dimension_semantics = [#tpu.dimension_semantics<parallel>], iteration_bounds = array<i64: 2>, scalar_prefetch = 0 : i64, scratch_operands = 0 : i64, tpu.core_type = #tpu.core_type<tc>, window_params = [{transform_indices = @transform_0, window_bounds = array<i64: 1, 128>}, {transform_indices = @transform_1, window_bounds = array<i64: 1, 128>}, {transform_indices = @transform_2, window_bounds = array<i64: 1, 128>}, {transform_indices = @transform_3, window_bounds = array<i64: 1, 128>}, {pipeline_mode = #tpu.pipeline_mode<synchronous>, transform_indices = @transform_4, window_bounds = array<i64: 6, 20>}, {pipeline_mode = #tpu.pipeline_mode<synchronous>, transform_indices = @transform_5, window_bounds = array<i64: 8, 10>}, {pipeline_mode = #tpu.pipeline_mode<synchronous>, transform_indices = @transform_6, window_bounds = array<i64: 32, 6>}, {pipeline_mode = #tpu.pipeline_mode<synchronous>, transform_indices = @transform_7, window_bounds = array<i64: 32, 8>}, {pipeline_mode = #tpu.pipeline_mode<synchronous>, transform_indices = @transform_8, window_bounds = array<i64: 32, 1>}, {pipeline_mode = #tpu.pipeline_mode<synchronous>, transform_indices = @transform_9, window_bounds = array<i64: 32, 1>}, {pipeline_mode = #tpu.pipeline_mode<synchronous>, transform_indices = @transform_10, window_bounds = array<i64: 32, 1>}, {pipeline_mode = #tpu.pipeline_mode<synchronous>, transform_indices = @transform_11, window_bounds = array<i64: 32, 1>}, {pipeline_mode = #tpu.pipeline_mode<synchronous>, transform_indices = @transform_12, window_bounds = array<i64: 32, 1>}, {pipeline_mode = #tpu.pipeline_mode<synchronous>, transform_indices = @transform_13, window_bounds = array<i64: 32, 32>}, {pipeline_mode = #tpu.pipeline_mode<synchronous>, transform_indices = @transform_14, window_bounds = array<i64: 32, 1>}, {pipeline_mode = #tpu.pipeline_mode<synchronous>, transform_indices = @transform_15, window_bounds = array<i64: 32, 1>}, {pipeline_mode = #tpu.pipeline_mode<synchronous>, transform_indices = @transform_16, window_bounds = array<i64: 32, 1>}, {pipeline_mode = #tpu.pipeline_mode<synchronous>, transform_indices = @transform_17, window_bounds = array<i64: 4, 32>}, {pipeline_mode = #tpu.pipeline_mode<synchronous>, transform_indices = @transform_18, window_bounds = array<i64: 4, 1>}, {transform_indices = @transform_19, window_bounds = array<i64: 4, 128>}]} {
    %0 = tpu.iota {dimensions = array<i32: 0>} : vector<20x128xi32>
    %c0 = arith.constant 0 : index
    %c0_0 = arith.constant 0 : index
    %1 = vector.load %arg1[%c0, %c0_0] : memref<1x128xi32, #tpu.memory_space<vmem>>, vector<1x128xi32>
    %2 = vector.broadcast %1 : vector<1x128xi32> to vector<20x128xi32>
    %3 = arith.cmpi eq, %0, %2 : vector<20x128xi32>
    %4 = arith.extui %3 : vector<20x128xi1> to vector<20x128xi32>
    %5 = arith.sitofp %4 : vector<20x128xi32> to vector<20x128xf32>
    %6 = tpu.iota {dimensions = array<i32: 0>} : vector<10x128xi32>
    %c0_1 = arith.constant 0 : index
    %c0_2 = arith.constant 0 : index
    %7 = vector.load %arg2[%c0_1, %c0_2] : memref<1x128xi32, #tpu.memory_space<vmem>>, vector<1x128xi32>
    %8 = vector.broadcast %7 : vector<1x128xi32> to vector<10x128xi32>
    %9 = arith.cmpi eq, %6, %8 : vector<10x128xi32>
    %10 = arith.extui %9 : vector<10x128xi1> to vector<10x128xi32>
    %11 = arith.sitofp %10 : vector<10x128xi32> to vector<10x128xf32>
    %c0_3 = arith.constant 0 : index
    %c0_4 = arith.constant 0 : index
    %12 = vector.load %arg5[%c0_3, %c0_4] : memref<6x20xf32, #tpu.memory_space<vmem>>, vector<6x20xf32>
    %cst = arith.constant dense<0.000000e+00> : vector<6x128xf32>
    %13 = tpu.matmul %12, %5, %cst {dimension_numbers = #tpu.dot_dimension_numbers<[1], [0], [0], [1], [0, 0, 1, 1], [], []>} : vector<6x20xf32>, vector<20x128xf32>, vector<6x128xf32> -> vector<6x128xf32>
    %c0_5 = arith.constant 0 : index
    %c0_6 = arith.constant 0 : index
    %14 = vector.load %arg6[%c0_5, %c0_6] : memref<8x10xf32, #tpu.memory_space<vmem>>, vector<8x10xf32>
    %cst_7 = arith.constant dense<0.000000e+00> : vector<8x128xf32>
    %15 = tpu.matmul %14, %11, %cst_7 {dimension_numbers = #tpu.dot_dimension_numbers<[1], [0], [0], [1], [0, 0, 1, 1], [], []>} : vector<8x10xf32>, vector<10x128xf32>, vector<8x128xf32> -> vector<8x128xf32>
    %c0_8 = arith.constant 0 : index
    %c0_9 = arith.constant 0 : index
    %16 = vector.load %arg7[%c0_8, %c0_9] : memref<32x6xf32, #tpu.memory_space<vmem>>, vector<32x6xf32>
    %c0_10 = arith.constant 0 : index
    %c0_11 = arith.constant 0 : index
    %17 = vector.load %arg8[%c0_10, %c0_11] : memref<32x8xf32, #tpu.memory_space<vmem>>, vector<32x8xf32>
    %c0_12 = arith.constant 0 : index
    %c0_13 = arith.constant 0 : index
    %18 = vector.load %arg9[%c0_12, %c0_13] : memref<32x1xf32, #tpu.memory_space<vmem>>, vector<32x1xf32>
    %c0_14 = arith.constant 0 : index
    %c0_15 = arith.constant 0 : index
    %19 = vector.load %arg10[%c0_14, %c0_15] : memref<32x1xf32, #tpu.memory_space<vmem>>, vector<32x1xf32>
    %c0_16 = arith.constant 0 : index
    %c0_17 = arith.constant 0 : index
    %20 = vector.load %arg11[%c0_16, %c0_17] : memref<32x1xf32, #tpu.memory_space<vmem>>, vector<32x1xf32>
    %cst_18 = arith.constant dense<0.000000e+00> : vector<32x128xf32>
    %21 = tpu.matmul %16, %13, %cst_18 {dimension_numbers = #tpu.dot_dimension_numbers<[1], [0], [0], [1], [0, 0, 1, 1], [], []>} : vector<32x6xf32>, vector<6x128xf32>, vector<32x128xf32> -> vector<32x128xf32>
    %cst_19 = arith.constant dense<0.000000e+00> : vector<32x128xf32>
    %22 = tpu.matmul %17, %15, %cst_19 {dimension_numbers = #tpu.dot_dimension_numbers<[1], [0], [0], [1], [0, 0, 1, 1], [], []>} : vector<32x8xf32>, vector<8x128xf32>, vector<32x128xf32> -> vector<32x128xf32>
    %23 = arith.addf %21, %22 : vector<32x128xf32>
    %c0_20 = arith.constant 0 : index
    %c0_21 = arith.constant 0 : index
    %24 = vector.load %arg3[%c0_20, %c0_21] : memref<1x128xf32, #tpu.memory_space<vmem>>, vector<1x128xf32>
    %25 = vector.broadcast %18 : vector<32x1xf32> to vector<32x128xf32>
    %26 = vector.broadcast %24 : vector<1x128xf32> to vector<32x128xf32>
    %27 = arith.mulf %25, %26 : vector<32x128xf32>
    %28 = arith.addf %23, %27 : vector<32x128xf32>
    %c0_22 = arith.constant 0 : index
    %c0_23 = arith.constant 0 : index
    %29 = vector.load %arg4[%c0_22, %c0_23] : memref<1x128xf32, #tpu.memory_space<vmem>>, vector<1x128xf32>
    %30 = vector.broadcast %19 : vector<32x1xf32> to vector<32x128xf32>
    %31 = vector.broadcast %29 : vector<1x128xf32> to vector<32x128xf32>
    %32 = arith.mulf %30, %31 : vector<32x128xf32>
    %33 = arith.addf %28, %32 : vector<32x128xf32>
    %34 = vector.broadcast %20 : vector<32x1xf32> to vector<32x128xf32>
    %35 = arith.addf %33, %34 : vector<32x128xf32>
    %c0_24 = arith.constant 0 : index
    %c0_25 = arith.constant 0 : index
    %36 = vector.load %arg12[%c0_24, %c0_25] : memref<32x1xf32, #tpu.memory_space<vmem>>, vector<32x1xf32>
    %c0_26 = arith.constant 0 : index
    %c0_27 = arith.constant 0 : index
    %37 = vector.load %arg13[%c0_26, %c0_27] : memref<32x1xf32, #tpu.memory_space<vmem>>, vector<32x1xf32>
    %cst_28 = arith.constant dense<0.000000e+00> : vector<128xf32>
    %38 = vector.multi_reduction <add>, %35, %cst_28 [0] : vector<32x128xf32> to vector<128xf32>
    %39 = vector.shape_cast %38 : vector<128xf32> to vector<1x128xf32>
    %cst_29 = arith.constant 3.200000e+01 : f32
    %40 = vector.broadcast %cst_29 : f32 to vector<1x128xf32>
    %41 = arith.divf %39, %40 : vector<1x128xf32>
    %42 = vector.broadcast %41 : vector<1x128xf32> to vector<32x128xf32>
    %43 = arith.subf %35, %42 : vector<32x128xf32>
    %44 = arith.mulf %43, %43 : vector<32x128xf32>
    %cst_30 = arith.constant dense<0.000000e+00> : vector<128xf32>
    %45 = vector.multi_reduction <add>, %44, %cst_30 [0] : vector<32x128xf32> to vector<128xf32>
    %46 = vector.shape_cast %45 : vector<128xf32> to vector<1x128xf32>
    %cst_31 = arith.constant 3.200000e+01 : f32
    %47 = vector.broadcast %cst_31 : f32 to vector<1x128xf32>
    %48 = arith.divf %46, %47 : vector<1x128xf32>
    %49 = vector.broadcast %41 : vector<1x128xf32> to vector<32x128xf32>
    %50 = arith.subf %35, %49 : vector<32x128xf32>
    %cst_32 = arith.constant 9.99999974E-6 : f32
    %51 = vector.broadcast %cst_32 : f32 to vector<1x128xf32>
    %52 = arith.addf %48, %51 : vector<1x128xf32>
    %53 = math.rsqrt %52 : vector<1x128xf32>
    %54 = vector.broadcast %53 : vector<1x128xf32> to vector<32x128xf32>
    %55 = arith.mulf %50, %54 : vector<32x128xf32>
    %56 = vector.broadcast %36 : vector<32x1xf32> to vector<32x128xf32>
    %57 = arith.mulf %55, %56 : vector<32x128xf32>
    %58 = vector.broadcast %37 : vector<32x1xf32> to vector<32x128xf32>
    %59 = arith.addf %57, %58 : vector<32x128xf32>
    %cst_33 = arith.constant 0.000000e+00 : f32
    %60 = vector.broadcast %cst_33 : f32 to vector<32x128xf32>
    %61 = arith.maximumf %59, %60 : vector<32x128xf32>
    %c0_34 = arith.constant 0 : index
    %c0_35 = arith.constant 0 : index
    %62 = vector.load %arg14[%c0_34, %c0_35] : memref<32x32xf32, #tpu.memory_space<vmem>>, vector<32x32xf32>
    %c0_36 = arith.constant 0 : index
    %c0_37 = arith.constant 0 : index
    %63 = vector.load %arg15[%c0_36, %c0_37] : memref<32x1xf32, #tpu.memory_space<vmem>>, vector<32x1xf32>
    %c0_38 = arith.constant 0 : index
    %c0_39 = arith.constant 0 : index
    %64 = vector.load %arg16[%c0_38, %c0_39] : memref<32x1xf32, #tpu.memory_space<vmem>>, vector<32x1xf32>
    %c0_40 = arith.constant 0 : index
    %c0_41 = arith.constant 0 : index
    %65 = vector.load %arg17[%c0_40, %c0_41] : memref<32x1xf32, #tpu.memory_space<vmem>>, vector<32x1xf32>
    %cst_42 = arith.constant dense<0.000000e+00> : vector<32x128xf32>
    %66 = tpu.matmul %62, %61, %cst_42 {dimension_numbers = #tpu.dot_dimension_numbers<[1], [0], [0], [1], [0, 0, 1, 1], [], []>} : vector<32x32xf32>, vector<32x128xf32>, vector<32x128xf32> -> vector<32x128xf32>
    %67 = vector.broadcast %63 : vector<32x1xf32> to vector<32x128xf32>
    %68 = arith.addf %66, %67 : vector<32x128xf32>
    %cst_43 = arith.constant dense<0.000000e+00> : vector<128xf32>
    %69 = vector.multi_reduction <add>, %68, %cst_43 [0] : vector<32x128xf32> to vector<128xf32>
    %70 = vector.shape_cast %69 : vector<128xf32> to vector<1x128xf32>
    %cst_44 = arith.constant 3.200000e+01 : f32
    %71 = vector.broadcast %cst_44 : f32 to vector<1x128xf32>
    %72 = arith.divf %70, %71 : vector<1x128xf32>
    %73 = vector.broadcast %72 : vector<1x128xf32> to vector<32x128xf32>
    %74 = arith.subf %68, %73 : vector<32x128xf32>
    %75 = arith.mulf %74, %74 : vector<32x128xf32>
    %cst_45 = arith.constant dense<0.000000e+00> : vector<128xf32>
    %76 = vector.multi_reduction <add>, %75, %cst_45 [0] : vector<32x128xf32> to vector<128xf32>
    %77 = vector.shape_cast %76 : vector<128xf32> to vector<1x128xf32>
    %cst_46 = arith.constant 3.200000e+01 : f32
    %78 = vector.broadcast %cst_46 : f32 to vector<1x128xf32>
    %79 = arith.divf %77, %78 : vector<1x128xf32>
    %80 = vector.broadcast %72 : vector<1x128xf32> to vector<32x128xf32>
    %81 = arith.subf %68, %80 : vector<32x128xf32>
    %cst_47 = arith.constant 9.99999974E-6 : f32
    %82 = vector.broadcast %cst_47 : f32 to vector<1x128xf32>
    %83 = arith.addf %79, %82 : vector<1x128xf32>
    %84 = math.rsqrt %83 : vector<1x128xf32>
    %85 = vector.broadcast %84 : vector<1x128xf32> to vector<32x128xf32>
    %86 = arith.mulf %81, %85 : vector<32x128xf32>
    %87 = vector.broadcast %64 : vector<32x1xf32> to vector<32x128xf32>
    %88 = arith.mulf %86, %87 : vector<32x128xf32>
    %89 = vector.broadcast %65 : vector<32x1xf32> to vector<32x128xf32>
    %90 = arith.addf %88, %89 : vector<32x128xf32>
    %cst_48 = arith.constant 0.000000e+00 : f32
    %91 = vector.broadcast %cst_48 : f32 to vector<32x128xf32>
    %92 = arith.maximumf %90, %91 : vector<32x128xf32>
    %c0_49 = arith.constant 0 : index
    %c0_50 = arith.constant 0 : index
    %93 = vector.load %arg18[%c0_49, %c0_50] : memref<4x32xf32, #tpu.memory_space<vmem>>, vector<4x32xf32>
    %c0_51 = arith.constant 0 : index
    %c0_52 = arith.constant 0 : index
    %94 = vector.load %arg19[%c0_51, %c0_52] : memref<4x1xf32, #tpu.memory_space<vmem>>, vector<4x1xf32>
    %cst_53 = arith.constant dense<0.000000e+00> : vector<4x128xf32>
    %95 = tpu.matmul %93, %92, %cst_53 {dimension_numbers = #tpu.dot_dimension_numbers<[1], [0], [0], [1], [0, 0, 1, 1], [], []>} : vector<4x32xf32>, vector<32x128xf32>, vector<4x128xf32> -> vector<4x128xf32>
    %96 = vector.broadcast %94 : vector<4x1xf32> to vector<4x128xf32>
    %97 = arith.addf %95, %96 : vector<4x128xf32>
    %c0_54 = arith.constant 0 : index
    %c0_55 = arith.constant 0 : index
    %98 = vector.load %arg20[%c0_54, %c0_55] : memref<4x128xf32, #tpu.memory_space<vmem>>, vector<4x128xf32>
    tpu.vector_store %arg20[%c0_54, %c0_55], %97 {strides = array<i32>} : memref<4x128xf32, #tpu.memory_space<vmem>>, vector<4x128xf32>,
    return
  }
  func.func @transform_0(%arg0: i32) -> (i32, i32) {
    %c0_i32 = arith.constant 0 : i32
    %c0_i32_0 = arith.constant 0 : i32
    return %c0_i32, %arg0 : i32, i32
  }
  func.func @transform_1(%arg0: i32) -> (i32, i32) {
    %c0_i32 = arith.constant 0 : i32
    %c0_i32_0 = arith.constant 0 : i32
    return %c0_i32, %arg0 : i32, i32
  }
  func.func @transform_2(%arg0: i32) -> (i32, i32) {
    %c0_i32 = arith.constant 0 : i32
    %c0_i32_0 = arith.constant 0 : i32
    return %c0_i32, %arg0 : i32, i32
  }
  func.func @transform_3(%arg0: i32) -> (i32, i32) {
    %c0_i32 = arith.constant 0 : i32
    %c0_i32_0 = arith.constant 0 : i32
    return %c0_i32, %arg0 : i32, i32
  }
  func.func @transform_4(%arg0: i32) -> (i32, i32) {
    %c0_i32 = arith.constant 0 : i32
    %c0_i32_0 = arith.constant 0 : i32
    %c0_i32_1 = arith.constant 0 : i32
    return %c0_i32, %c0_i32_0 : i32, i32
  }
  func.func @transform_5(%arg0: i32) -> (i32, i32) {
    %c0_i32 = arith.constant 0 : i32
    %c0_i32_0 = arith.constant 0 : i32
    %c0_i32_1 = arith.constant 0 : i32
    return %c0_i32, %c0_i32_0 : i32, i32
  }
  func.func @transform_6(%arg0: i32) -> (i32, i32) {
    %c0_i32 = arith.constant 0 : i32
    %c0_i32_0 = arith.constant 0 : i32
    %c0_i32_1 = arith.constant 0 : i32
    return %c0_i32, %c0_i32_0 : i32, i32
  }
  func.func @transform_7(%arg0: i32) -> (i32, i32) {
    %c0_i32 = arith.constant 0 : i32
    %c0_i32_0 = arith.constant 0 : i32
    %c0_i32_1 = arith.constant 0 : i32
    return %c0_i32, %c0_i32_0 : i32, i32
  }
  func.func @transform_8(%arg0: i32) -> (i32, i32) {
    %c0_i32 = arith.constant 0 : i32
    %c0_i32_0 = arith.constant 0 : i32
    %c0_i32_1 = arith.constant 0 : i32
    return %c0_i32, %c0_i32_0 : i32, i32
  }
  func.func @transform_9(%arg0: i32) -> (i32, i32) {
    %c0_i32 = arith.constant 0 : i32
    %c0_i32_0 = arith.constant 0 : i32
    %c0_i32_1 = arith.constant 0 : i32
    return %c0_i32, %c0_i32_0 : i32, i32
  }
  func.func @transform_10(%arg0: i32) -> (i32, i32) {
    %c0_i32 = arith.constant 0 : i32
    %c0_i32_0 = arith.constant 0 : i32
    %c0_i32_1 = arith.constant 0 : i32
    return %c0_i32, %c0_i32_0 : i32, i32
  }
  func.func @transform_11(%arg0: i32) -> (i32, i32) {
    %c0_i32 = arith.constant 0 : i32
    %c0_i32_0 = arith.constant 0 : i32
    %c0_i32_1 = arith.constant 0 : i32
    return %c0_i32, %c0_i32_0 : i32, i32
  }
  func.func @transform_12(%arg0: i32) -> (i32, i32) {
    %c0_i32 = arith.constant 0 : i32
    %c0_i32_0 = arith.constant 0 : i32
    %c0_i32_1 = arith.constant 0 : i32
    return %c0_i32, %c0_i32_0 : i32, i32
  }
  func.func @transform_13(%arg0: i32) -> (i32, i32) {
    %c0_i32 = arith.constant 0 : i32
    %c0_i32_0 = arith.constant 0 : i32
    %c0_i32_1 = arith.constant 0 : i32
    return %c0_i32, %c0_i32_0 : i32, i32
  }
  func.func @transform_14(%arg0: i32) -> (i32, i32) {
    %c0_i32 = arith.constant 0 : i32
    %c0_i32_0 = arith.constant 0 : i32
    %c0_i32_1 = arith.constant 0 : i32
    return %c0_i32, %c0_i32_0 : i32, i32
  }
  func.func @transform_15(%arg0: i32) -> (i32, i32) {
    %c0_i32 = arith.constant 0 : i32
    %c0_i32_0 = arith.constant 0 : i32
    %c0_i32_1 = arith.constant 0 : i32
    return %c0_i32, %c0_i32_0 : i32, i32
  }
  func.func @transform_16(%arg0: i32) -> (i32, i32) {
    %c0_i32 = arith.constant 0 : i32
    %c0_i32_0 = arith.constant 0 : i32
    %c0_i32_1 = arith.constant 0 : i32
    return %c0_i32, %c0_i32_0 : i32, i32
  }
  func.func @transform_17(%arg0: i32) -> (i32, i32) {
    %c0_i32 = arith.constant 0 : i32
    %c0_i32_0 = arith.constant 0 : i32
    %c0_i32_1 = arith.constant 0 : i32
    return %c0_i32, %c0_i32_0 : i32, i32
  }
  func.func @transform_18(%arg0: i32) -> (i32, i32) {
    %c0_i32 = arith.constant 0 : i32
    %c0_i32_0 = arith.constant 0 : i32
    %c0_i32_1 = arith.constant 0 : i32
    return %c0_i32, %c0_i32_0 : i32, i32
  }
  func.func @transform_19(%arg0: i32) -> (i32, i32) {
    %c0_i32 = arith.constant 0 : i32
    %c0_i32_0 = arith.constant 0 : i32
    return %c0_i32, %arg0 : i32, i32
  }
}

</mosaic_0001>

<bundles_post_ra>
// kernel: tpu_custom_call.1
= control target key start
LH: loop header
LB: loop body
LE: loop exit
PB: predicated region body
PF: predicated region fallthrough
CT: control target
= control target key end

     0   :  { %s2285_s0 = inlined_call_operand.vmem [shape: s32[1,256], index: 0, kind: input, shape index: {}]   ;;  %s2286_s1 = inlined_call_operand.vmem [shape: s32[1,256], index: 1, kind: input, shape index: {}]   ;;  %s2287_s2 = inlined_call_operand.vmem [shape: f32[1,256], index: 2, kind: input, shape index: {}]   ;;  %s2288_s3 = inlined_call_operand.vmem [shape: f32[1,256], index: 3, kind: input, shape index: {}]   ;;  %s2289_s4 = inlined_call_operand.vmem [shape: f32[6,20], index: 4, kind: input, shape index: {}]   ;;  %s2290_s5 = inlined_call_operand.vmem [shape: f32[8,10], index: 5, kind: input, shape index: {}]   ;;  %s2291_s6 = inlined_call_operand.vmem [shape: f32[32,6], index: 6, kind: input, shape index: {}]   ;;  %s2292_s7 = inlined_call_operand.vmem [shape: f32[32,8], index: 7, kind: input, shape index: {}]   ;;  %s2293_s8 = inlined_call_operand.vmem [shape: f32[32,1], index: 8, kind: input, shape index: {}]   ;;  %s2294_s9 = inlined_call_operand.vmem [shape: f32[32,1], index: 9, kind: input, shape index: {}]   ;;  %s2295_s10 = inlined_call_operand.vmem [shape: f32[32,1], index: 10, kind: input, shape index: {}]   ;;  %s2296_s11 = inlined_call_operand.vmem [shape: f32[32,1], index: 11, kind: input, shape index: {}]   ;;  %s2297_s12 = inlined_call_operand.vmem [shape: f32[32,1], index: 12, kind: input, shape index: {}]   ;;  %s2298_s13 = inlined_call_operand.vmem [shape: f32[32,32], index: 13, kind: input, shape index: {}]   ;;  %s2299_s14 = inlined_call_operand.vmem [shape: f32[32,1], index: 14, kind: input, shape index: {}]   ;;  %s2300_s15 = inlined_call_operand.vmem [shape: f32[32,1], index: 15, kind: input, shape index: {}]   ;;  %s2301_s16 = inlined_call_operand.vmem [shape: f32[32,1], index: 16, kind: input, shape index: {}]   ;;  %s2302_s17 = inlined_call_operand.vmem [shape: f32[4,32], index: 17, kind: input, shape index: {}]   ;;  %s2303_s18 = inlined_call_operand.vmem [shape: f32[4,1], index: 18, kind: input, shape index: {}]   ;;  %s2304_s19 = inlined_call_operand.hbm [shape: f32[4,256], index: 19, kind: output, shape index: {}]  }
   0x1   :  { %2308 = sst [smem:[#allocation8_spill]] %s2285_s0 }
   0x2   :  { %2309 = sst [smem:[#allocation9_spill]] %s2286_s1 }
   0x3   :  { %2310 = sst [smem:[#allocation10_spill]] %s2287_s2 }
   0x4   :  { %2311 = sst [smem:[#allocation11_spill]] %s2288_s3 }
   0x5   :  { %2312 = sst [smem:[#allocation12_spill]] %s2289_s4 }
   0x6   :  { %2313 = sst [smem:[#allocation13_spill]] %s2290_s5 }
   0x7   :  { %24 = vsyncpa [#allocation3], 0 }
   0x8   :  { %26 = vsyncpa [#allocation3 + $0x1], 0  ;;  %s2004_s0 = smov 0   ;;  %s2006_s30 = smov 0  }
   0x9   :  { %s2008_s20 = smov 0   ;;  %s2010_s21 = smov 0  }
   0xa LB: > { %2314 = sst [smem:[#allocation5_spill]] %s1891_s20  ;;  %s2025_s1 = sadd.s32 4294967295, %s1895_s21   ;;  %s1895_s21 = sphi %s2010_s21, %s2325_s21   ;;  %s1891_s20 = sphi %s2008_s20, %s2327_s20   ;;  %s1887_s30 = sphi %s2006_s30, %s2329_s30   ;;  %s1883_s0 = sphi %s2004_s0, %s2328_s0  }
   0xb   : > { %s1631_s22 = sadd.s32 4294967294, %s1895_s21   ;;  %s2029_s2 = sadd.s32 1, %s1895_s21  }
   0xc   : > { %2315 = sst [smem:[#allocation6_spill]] %s2029_s2  ;;  %s458_s23 = sadd.s32 1, %s1891_s20 }
   0xd   : > { %s455_s24 = ssub.s32 %s1895_s21, %s2029_s2  ;;  %p468_p0 = scmp.ne.s32.totalorder %s1891_s20, %s1887_s30 }
   0xe   : > { %p456_p1 = scmp.eq.s32.totalorder %s455_s24, 0  ;;  %p469_p2 = scmp.eq.s32.totalorder %s2025_s1, 1 }
   0xf   : > { %p474_p3 = scmp.ne.s32.totalorder %s1887_s30, %s1883_s0  ;;  %p475_p4 = scmp.eq.s32.totalorder %s1631_s22, 1 }
  0x10   : > { %s2040_s25 = scalar_select %p456_p1, %s1891_s20, %s458_s23  }
  0x11   : > { %p2042_p5 = por %p469_p2, %p468_p0  ;;  %p2046_p6 = por %p475_p4, %p474_p3 }
  0x12   : > { %2316 = sst [smem:[#allocation7_spill]] %s2040_s25  ;;  %p1634_p7 = scmp.ge.s32.totalorder %s1895_s21, 1 }
  0x13   : > { %p562_p8 = scmp.lt.s32.totalorder %s1895_s21, 3 }
  0x15   : > { %p563_p9 = pnand %p1634_p7, %p562_p8 }
  0x16   : > { %p625_p10 = scmp.lt.s32.totalorder (!%p563_p9), %s2025_s1, 1  ;;  %v637_v0 = vlaneseq (!%p563_p9)  ;;  %v1897_v1 = vmov (!%p563_p9), 0.0|0.0   ;;  %vm1898_vm0 = vmmov (!%p563_p9), 0   ;;  %v1899_v3 = vmov (!%p563_p9), 0.0   ;;  %s2319_s22 = sld [smem:[#allocation9_spill]] (!%p563_p9)  ;;  %v828_v15 = vld [vmem:[%s2292_s7] sm:$0xff] (!%p563_p9) }
  0x17   : > { %566 = sbr.rel (%p563_p9) target bundleno = 1078 (0x436), region = 96  ;;  %1760 = vmatprep.subr.bf16.mxu1 (!%p563_p9), %v1897_v1  ;;  %1757 = vmatprep.subr.bf16.mxu0 (!%p563_p9), %v1897_v1  ;;  %vm750_vm1 = vcmask (!%p563_p9), 1041408   ;;  %s2320_s20 = sld [smem:[#allocation8_spill]] (!%p563_p9)  ;;  %v1900_v9 = vmov (!%p563_p9), 1.0   ;;  %v1901_v11 = vmov (!%p563_p9), 1.0|1.0  }
  0x18   : > { %v638_v2 = vshrl.u32 (!%p563_p9), %v637_v0, 7  ;;  %1713 = vmatprep.mubr.msk.f32.mxu1 (!%p563_p9), %vm1898_vm0, %v1899_v3  ;;  %1706 = vmatprep.mubr.msk.f32.mxu0 (!%p563_p9), %vm1898_vm0, %v1899_v3  ;;  %s2321_s5 = sld [smem:[#allocation13_spill]] (!%p563_p9)  ;;  %vm746_vm9 = vcmask (!%p563_p9), 80896   ;;  %vm671_vm10 = vcmask (!%p563_p9), 1043456   ;;  %s2322_s4 = sld [smem:[#allocation12_spill]] (!%p563_p9)  ;;  %vm667_vm11 = vcmask (!%p563_p9), 162816  }
  0x19   : > { %vm844_vm12 = vcmask (!%p563_p9), 64512   ;;  %v832_v16 = vld [vmem:[%s2293_s8] sm:$0xff] (!%p563_p9)  ;;  %v834_v17 = vld [vmem:[%s2293_s8 + $0x10] sm:$0xff] (!%p563_p9)  ;;  %v1902_v18 = vmov (!%p563_p9), 0   ;;  %v833_v19 = vld [vmem:[%s2293_s8 + $0x8] sm:$0xff] (!%p563_p9)  ;;  %vm955_vm13 = vcmask (!%p563_p9), 1045504  }
  0x1a   : > { %v639_v4 = vadd.s32 (!%p563_p9), 8, %v638_v2  ;;  %v640_v5 = vadd.s32 (!%p563_p9), 16, %v638_v2  ;;  %1827 = vset.pattern.permute.xlu0 (!%p563_p9), %v1902_v18  ;;  %1828 = vset.pattern.permute.xlu1 (!%p563_p9), %v1902_v18  ;;  %v836_v20 = vld [vmem:[%s2294_s9] sm:$0xff] (!%p563_p9)  ;;  %v837_v21 = vld [vmem:[%s2294_s9 + $0x8] sm:$0xff] (!%p563_p9)  ;;  %v835_v22 = vld [vmem:[%s2293_s8 + $0x18] sm:$0xff] (!%p563_p9)  ;;  %vm942_vm14 = vcmask (!%p563_p9), 48128  }
  0x1b   : > { %1047 = vperm.xlu0 (!%p563_p9), %1827, %v832_v16   ;;  %1057 = vperm.xlu1 (!%p563_p9), %1828, %v834_v17   ;;  %v838_v23 = vld [vmem:[%s2294_s9 + $0x10] sm:$0xff] (!%p563_p9)  ;;  %v839_v24 = vld [vmem:[%s2294_s9 + $0x18] sm:$0xff] (!%p563_p9)  ;;  %v840_v25 = vld [vmem:[%s2295_s10] sm:$0xff] (!%p563_p9)  ;;  %vm1269_vm15 = vcmask (!%p563_p9), 261120  }
  0x1c   : > { %v841_v26 = vld [vmem:[%s2295_s10 + $0x8] sm:$0xff] (!%p563_p9)  ;;  %v842_v27 = vld [vmem:[%s2295_s10 + $0x10] sm:$0xff] (!%p563_p9)  ;;  %v843_v28 = vld [vmem:[%s2295_s10 + $0x18] sm:$0xff] (!%p563_p9) }
  0x1d   : > { %v1138_v29 = vld [vmem:[%s2296_s11] sm:$0xff] (!%p563_p9)  ;;  %v1139_v30 = vld [vmem:[%s2296_s11 + $0x8] sm:$0xff] (!%p563_p9)  ;;  %v1140_v33 = vld [vmem:[%s2296_s11 + $0x10] sm:$0xff] (!%p563_p9) }
  0x1e   : > { %s2056_s27 = scalar_select %p625_p10, %s2025_s1, 1  ;;  %v745_v12 = vld [vmem:[%s2321_s5] sm:$0xff]  ;;  %v1143_v32 = vld [vmem:[%s2297_s12 + $0x8] sm:$0xff]  ;;  %v1141_v34 = vld [vmem:[%s2296_s11 + $0x18] sm:$0xff] }
  0x1f   : > { %v666_v14 = vld [vmem:[%s2322_s4] sm:$0x3f]  ;;  %1052 = vperm.xlu0 %1827, %v833_v19   ;;  %1082 = vperm.xlu1 %1828, %v836_v20   ;;  %v1144_v35 = vld [vmem:[%s2297_s12 + $0x10] sm:$0xff]  ;;  %v1145_v36 = vld [vmem:[%s2297_s12 + $0x18] sm:$0xff] }
  0x20   : > { %s630_s23 = scalar_lea.vmem %s2319_s22, %s2056_s27  ;;  %s627_s2 = scalar_lea.vmem %s2320_s20, %s2056_s27  ;;  %v1142_v31 = vld [vmem:[%s2297_s12] sm:$0xff]  ;;  %v1238_v38 = vld [vmem:[%s2299_s14 + $0x8] sm:$0xff]  ;;  %v1239_v39 = vld [vmem:[%s2299_s14 + $0x10] sm:$0xff] }
  0x21   : > { %v1640_v6 = vld [vmem:[%s630_s23] ss:$0 sm:$0xff]  ;;  %v1240_v40 = vld [vmem:[%s2299_s14 + $0x18] sm:$0xff]  ;;  %v1242_v42 = vld [vmem:[%s2300_s15 + $0x8] sm:$0xff]  ;;  %s2323_s20 = sld [smem:[#allocation10_spill]]  ;;  %s2324_s23 = sld [smem:[#allocation11_spill]] }
  0x22   : > { %v1636_v7 = vld [vmem:[%s627_s2] ss:$0 sm:$0xff]  ;;  %vm660_vm2 = vcmp.eq.s32.totalorder %v638_v2, %v1640_v6  ;;  %vm661_vm3 = vcmp.eq.s32.totalorder %v639_v4, %v1640_v6  ;;  %v1246_v44 = vld [vmem:[%s2301_s16 + $0x8] sm:$0xff]  ;;  %v1243_v45 = vld [vmem:[%s2300_s15 + $0x10] sm:$0xff]  ;;  %s622_s22 = sand.u32 1, %s1887_s30  }
  0x23   : > { %vm646_vm4 = vcmp.eq.s32.totalorder %v638_v2, %v1636_v7  ;;  %vm647_vm5 = vcmp.eq.s32.totalorder %v639_v4, %v1636_v7  ;;  %v1642_v8 = vsel %vm661_vm3, 1.0, %v1899_v3  ;;  %vm1762_vm6 = vmpackc.low %vm750_vm1, %vm660_vm2  ;;  %vm648_vm7 = vcmp.eq.s32.totalorder %v640_v5, %v1636_v7  ;;  %1087 = vperm.xlu0 %1827, %v837_v21   ;;  %1062 = vperm.xlu1 %1828, %v835_v22   ;;  %v1237_v37 = vld [vmem:[%s2299_s14] sm:$0xff]  ;;  %v1244_v46 = vld [vmem:[%s2300_s15 + $0x18] sm:$0xff] }
  0x24   : > { %v1761_v10 = vpack.c.bf16 %v1642_v8, %v1900_v9  ;;  %vm1758_vm8 = vmpackc.low %vm647_vm5, %vm646_vm4  ;;  %v1639_v13 = vsel %vm648_vm7, 1.0, %v1899_v3  ;;  %v1241_v41 = vld [vmem:[%s2300_s15] sm:$0xff]  ;;  %v1247_v47 = vld [vmem:[%s2301_s16 + $0x10] sm:$0xff] }
  0x25   : > { %1759 = vmatpush3.bf16.msk.msra.mxu0 %vm1758_vm8, %v1901_v11  ;;  %v1245_v43 = vld [vmem:[%s2301_s16] sm:$0xff]  ;;  %v1248_v48 = vld [vmem:[%s2301_s16 + $0x18] sm:$0xff]  ;;  %v829_v51 = vld [vmem:[%s2292_s7 + $0x8] sm:$0xff] }
  0x26   : > { %1763 = vmatpush3.bf16.msk.msra.mxu1 %vm1762_vm6, %v1761_v10  ;;  %1704 = vmatprep.subr.mxu0 %v1899_v3  ;;  %v1454_v49 = vld [vmem:[%s2303_s18] sm:$0xf]  ;;  %v830_v54 = vld [vmem:[%s2292_s7 + $0x10] sm:$0xff]  ;;  %v831_v56 = vld [vmem:[%s2292_s7 + $0x18] sm:$0xff] }
  0x27   : > { %1092 = vperm.xlu0 %1827, %v838_v23   ;;  %1097 = vperm.xlu1 %1828, %v839_v24   ;;  %v824_v57 = vld [vmem:[%s2291_s6] sm:$0xff]  ;;  %v825_v58 = vld [vmem:[%s2291_s6 + $0x8] sm:$0xff]  ;;  %v826_v59 = vld [vmem:[%s2291_s6 + $0x10] sm:$0xff]  ;;  %s633_s2 = scalar_lea.vmem %s2323_s20, %s2056_s27  ;;  %s636_s24 = scalar_lea.vmem %s2324_s23, %s2056_s27 }
  0x28   : > { %v827_v60 = vld [vmem:[%s2291_s6 + $0x18] sm:$0xff]  ;;  %v1233_v61 = vld [vmem:[%s2298_s13] sm:$0xff]  ;;  %s1635_s23 = sshll.u32 %s622_s22, 2  ;;  %s1535_s20 = scalar_lea.sflag [#allocation3], %s622_s22 }
  0x29   : > { %1714 = vmatmul.mubr.msk.f32.vlgmr.msra.gmra.mrb[0].mxu1 %vm746_vm9, %v745_v12  ;;  %1705 = vmatpush3.msk.msra.mxu0 %vm671_vm10, %v1639_v13  ;;  %v1659_v6 = vld [vmem:[%s633_s2] ss:$0 sm:$0xff]  ;;  %s624_s27 = scalar_lea.vmem [#allocation2], %s1635_s23 }
  0x2a   : > { %1707 = vmatmul.mubr.msk.f32.vlgmr.msra.gmra.mrb[0].mxu0 %vm667_vm11, %v666_v14  ;;  %1718 = vmatprep.mubr.msk.f32.mxu1 %vm844_vm12, %v828_v15  ;;  %v1660_v8 = vld [vmem:[%s636_s24] ss:$0 sm:$0xff]  ;;  %s1667_s24 = sshll.u32 %s2025_s1, 6  ;;  %s1548_s28 = sshll.u32 %s624_s27, 4  ;;  %s2245_s28 = int_to_ptr.vmem [resolvable:$true] %s1548_s28 }
  0x2b   : > { %1116 = vperm.xlu0 %1827, %v840_v25   ;;  %1121 = vperm.xlu1 %1828, %v841_v26   ;;  %s2243_s5 = scalar_lea.hbm %s2304_s19, %s1667_s24  ;;  %s1833_s2 = scalar_lea.vmem %s2245_s28, 64 }
  0x2c   : > { %1740 = vmatprep.mubr.msk.f32.mxu0 %vm1269_vm15, %v1233_v61  ;;  %p1834_p11 = scmp.ne.s32.totalorder %s2245_s28, %s1833_s2  ;;  %s1903_s1 = smov [#allocation2]  }
  0x2d   : > { %s1837_s29 = sshll.u32 %s1903_s1, 4  ;;  %s1838_s29 = int_to_ptr.vmem [resolvable:$false] %s1837_s29 }
  0x2e   : > { %p1835_p12 = pnand %p1834_p11, %p2042_p5  ;;  %s1839_s23 = scalar_lea.vmem %s1838_s29, 128 }
  0x2f   : > { %1126 = vperm.xlu0 %1827, %v842_v27   ;;  %1131 = vperm.xlu1 %1828, %v843_v28   ;;  %p1840_p0 = scmp.lt.s32.totalorder %s2245_s28, %s1838_s29  ;;  %p1841_p1 = scmp.lt.s32.totalorder %s1839_s23, %s1833_s2 }
  0x30   : > { %p1836_p13 = pneg %p1835_p12 }
  0x31   : > { %p1842_p2 = por %p1841_p1, %p1840_p0 }
  0x33   : > { %1183 = vperm.xlu0 %1827, %v1138_v29   ;;  %1188 = vperm.xlu1 %1828, %v1139_v30   ;;  %p1843_p3 = pnand %p1842_p2, %p1836_p13 }
  0x37   : > { %1207 = vperm.xlu0 %1827, %v1142_v31   ;;  %1212 = vperm.xlu1 %1828, %v1143_v32  }
  0x3b   : > { %1193 = vperm.xlu0 %1827, %v1140_v33   ;;  %1198 = vperm.xlu1 %1828, %v1141_v34  }
  0x3f   : > { %1217 = vperm.xlu0 %1827, %v1144_v35   ;;  %1222 = vperm.xlu1 %1828, %v1145_v36  }
  0x43   : > { %1251 = vperm.xlu0 %1827, %v1237_v37   ;;  %1256 = vperm.xlu1 %1828, %v1238_v38  }
  0x47   : > { %1261 = vperm.xlu0 %1827, %v1239_v39   ;;  %1266 = vperm.xlu1 %1828, %v1240_v40  }
  0x4b   : > { %1403 = vperm.xlu0 %1827, %v1241_v41   ;;  %1408 = vperm.xlu1 %1828, %v1242_v42  }
  0x4f   : > { %1427 = vperm.xlu0 %1827, %v1245_v43   ;;  %1432 = vperm.xlu1 %1828, %v1246_v44  }
  0x53   : > { %1413 = vperm.xlu0 %1827, %v1243_v45   ;;  %1418 = vperm.xlu1 %1828, %v1244_v46  }
  0x57   : > { %1437 = vperm.xlu0 %1827, %v1247_v47   ;;  %1442 = vperm.xlu1 %1828, %v1248_v48  }
  0x5b   : > { %1457 = vperm.xlu0 %1827, %v1454_v49  }
  0x9a   : > { %v1048_v62 = vpop.permute.xlu0 %1047  ;;  %v1058_v63 = vpop.permute.xlu1 %1057 }
  0x9b   : > { %v1071_v11 = vmul.f32 %v1659_v6, %v1048_v62  ;;  %v1073_v21 = vmul.f32 %v1659_v6, %v1058_v63 }
  0x9e   : > { %v1053_v0 = vpop.permute.xlu0 %1052  ;;  %v1083_v2 = vpop.permute.xlu1 %1082 }
  0x9f   : > { %v1072_v10 = vmul.f32 %v1659_v6, %v1053_v0  ;;  %v1106_v16 = vmul.f32 %v1660_v8, %v1083_v2 }
  0xa2   : > { %v1088_v4 = vpop.permute.xlu0 %1087  ;;  %v1063_v5 = vpop.permute.xlu1 %1062 }
  0xa3   : > { %v1107_v13 = vmul.f32 %v1660_v8, %v1088_v4  ;;  %v1074_v18 = vmul.f32 %v1659_v6, %v1063_v5 }
  0xa6   : > { %v1093_v7 = vpop.permute.xlu0 %1092  ;;  %v1098_v9 = vpop.permute.xlu1 %1097 }
  0xa7   : > { %v1108_v28 = vmul.f32 %v1660_v8, %v1093_v7  ;;  %v1109_v29 = vmul.f32 %v1660_v8, %v1098_v9 }
  0xaa   : > { %v1117_v19 = vpop.permute.xlu0 %1116  ;;  %v1122_v22 = vpop.permute.xlu1 %1121 }
  0xae   : > { %v1127_v35 = vpop.permute.xlu0 %1126  ;;  %v1132_v37 = vpop.permute.xlu1 %1131 }
  0xb2   : > { %v1184_v2 = vpop.permute.xlu0 %1183  ;;  %v1189_v4 = vpop.permute.xlu1 %1188 }
  0xb6   : > { %v1208_v7 = vpop.permute.xlu0 %1207  ;;  %v1213_v8 = vpop.permute.xlu1 %1212 }
  0xba   : > { %v1194_v9 = vpop.permute.xlu0 %1193 }
  0xfc   : > { %v820_v50 = vpop.f32.mrb[0].mxu1 }
  0xfd   : > { %v1715_v52 = vpop.f32.mrb[1].mxu1  ;;  %1716 = vmatprep.subr.mxu1 %v820_v50  ;;  %v741_v53 = vpop.f32.mrb[0].mxu0 }
  0xfe   : > { %1717 = vmatpush3.msra.mxu1 %v820_v50  ;;  %v1708_v55 = vpop.f32.mrb[1].mxu0 }
  0xff   : > { %1719 = vmatmul.mubr.msk.f32.vlgmr.msra.gmra.mrb[2].mxu1 %vm844_vm12, %v829_v51  ;;  %1724 = vmatprep.subr.msk.mxu1 %vm955_vm13, %v741_v53 }
 0x100   : > { %1725 = vmatpush3.msk.msra.mxu1 %vm955_vm13, %v741_v53  ;;  %1721 = vmatprep.mubr.msk.f32.mxu1 %vm844_vm12, %v830_v54 }
 0x103   : > { %1722 = vmatmul.mubr.msk.f32.gmra.mrb[4].mxu1 %vm844_vm12, %v831_v56 }
 0x104   : > { %1726 = vmatprep.mubr.msk.f32.mxu1 %vm942_vm14, %v824_v57 }
 0x107   : > { %1727 = vmatmul.mubr.msk.f32.vlgmr.msra.gmra.mrb[2].mxu1 %vm942_vm14, %v825_v58 }
 0x108   : > { %1729 = vmatprep.mubr.msk.f32.mxu1 %vm942_vm14, %v826_v59 }
 0x10b   : > { %1730 = vmatmul.mubr.msk.f32.gmra.mrb[4].mxu1 %vm942_vm14, %v827_v60 }
 0x1da   : > { %v1728_v12 = vpop.f32.mrb[2].mxu1 }
 0x1db   : > { %v1076_v14 = vadd.f32 %v1728_v12, %v1072_v10  ;;  %v1025_v15 = vpop.f32.mrb[3].mxu1  ;;  %v1199_v10 = vpop.permute.xlu1 %1198 }
 0x1dc   : > { %v1075_v17 = vadd.f32 %v1071_v11, %v1025_v15 }
 0x1dd   : > { %v1111_v20 = vadd.f32 %v1107_v13, %v1076_v14 }
 0x1de   : > { %v1110_v23 = vadd.f32 %v1106_v16, %v1075_v17  ;;  %v1731_v24 = vpop.f32.mrb[4].mxu1 }
 0x1df   : > { %v1135_v25 = vadd.f32 %v1122_v22, %v1111_v20  ;;  %v1078_v26 = vadd.f32 %v1731_v24, %v1074_v18  ;;  %v1035_v27 = vpop.f32.mrb[5].mxu1  ;;  %v1218_v20 = vpop.permute.xlu0 %1217 }
 0x1e0   : > { %v1134_v30 = vadd.f32 %v1117_v19, %v1110_v23  ;;  %v1077_v31 = vadd.f32 %v1073_v21, %v1035_v27  ;;  %v1223_v21 = vpop.permute.xlu1 %1222 }
 0x1e1   : > { %v1113_v33 = vadd.f32 %v1109_v29, %v1078_v26 }
 0x1e2   : > { %v1146_v32 = vadd.f32 %v1135_v25, %v1134_v30  ;;  %v1112_v34 = vadd.f32 %v1108_v28, %v1077_v31 }
 0x1e3   : > { %v1137_v38 = vadd.f32 %v1132_v37, %v1113_v33  ;;  %v1235_v33 = vld [vmem:[%s2298_s13 + $0x10] sm:$0xff] }
 0x1e4   : > { %v1136_v36 = vadd.f32 %v1127_v35, %v1112_v34  ;;  %v1236_v34 = vld [vmem:[%s2298_s13 + $0x18] sm:$0xff]  ;;  %v1252_v35 = vpop.permute.xlu0 %1251 }
 0x1e6   : > { %v1147_v39 = vadd.f32 %v1146_v32, %v1136_v36  ;;  %v1234_v32 = vld [vmem:[%s2298_s13 + $0x8] sm:$0xff] }
 0x1e8   : > { %v1148_v40 = vadd.f32 %v1147_v39, %v1137_v38 }
 0x1ea   : > { %v1149_v41 = vrot.slane %v1148_v40, 4 }
 0x1ec   : > { %v1150_v42 = vadd.f32 %v1149_v41, %v1148_v40 }
 0x1ee   : > { %v1151_v43 = vrot.slane %v1150_v42, 2 }
 0x1f0   : > { %v1152_v44 = vadd.f32 %v1151_v43, %v1150_v42  ;;  %v1262_v43 = vpop.permute.xlu0 %1261 }
 0x1f2   : > { %v1153_v45 = vrot.slane %v1152_v44, 1 }
 0x1f4   : > { %v1154_v46 = vadd.f32 %v1153_v45, %v1152_v44 }
 0x1f6   : > { %v1156_v47 = vmul.f32 0.03125, %v1154_v46 }
 0x1f8   : > { %v1157_v48 = vsub.f32 %v1134_v30, %v1156_v47  ;;  %v1158_v49 = vsub.f32 %v1135_v25, %v1156_v47  ;;  %v1159_v50 = vsub.f32 %v1136_v36, %v1156_v47  ;;  %v1160_v51 = vsub.f32 %v1137_v38, %v1156_v47  ;;  %v1257_v36 = vpop.permute.xlu1 %1256 }
 0x1fa   : > { %v1161_v52 = vmul.f32 %v1157_v48, %v1157_v48  ;;  %v1162_v53 = vmul.f32 %v1158_v49, %v1158_v49  ;;  %v1163_v54 = vmul.f32 %v1159_v50, %v1159_v50  ;;  %v1164_v56 = vmul.f32 %v1160_v51, %v1160_v51 }
 0x1fc   : > { %v1165_v55 = vadd.f32 %v1162_v53, %v1161_v52  ;;  %v1267_v46 = vpop.permute.xlu1 %1266 }
 0x1fe   : > { %v1166_v57 = vadd.f32 %v1165_v55, %v1163_v54 }
 0x200   : > { %v1167_v58 = vadd.f32 %v1166_v57, %v1164_v56 }
 0x202   : > { %v1168_v59 = vrot.slane %v1167_v58, 4 }
 0x204   : > { %v1169_v60 = vadd.f32 %v1168_v59, %v1167_v58 }
 0x206   : > { %v1170_v61 = vrot.slane %v1169_v60, 2 }
 0x208   : > { %v1171_v62 = vadd.f32 %v1170_v61, %v1169_v60 }
 0x20a   : > { %v1172_v63 = vrot.slane %v1171_v62, 1 }
 0x20c   : > { %v1173_v0 = vadd.f32 %v1172_v63, %v1171_v62 }
 0x20e   : > { %v1174_v5 = vmul.f32 0.03125, %v1173_v0 }
 0x210   : > { %v1175_v6 = vadd.f32 1e-05, %v1174_v5 }
 0x212   : > { %1829 = vrsqrt.f32 %v1175_v6 }
 0x21c   : > { %v1830_v11 = vpop.eup %1829 }
 0x21d   : > { %v1179_v12 = vmul.f32 %v1830_v11, %v1159_v50  ;;  %v1177_v13 = vmul.f32 %v1830_v11, %v1157_v48  ;;  %v1178_v14 = vmul.f32 %v1830_v11, %v1158_v49  ;;  %v1180_v15 = vmul.f32 %v1830_v11, %v1160_v51  ;;  %v1404_v11 = vpop.permute.xlu0 %1403 }
 0x21f   : > { %v1201_v16 = vmul.f32 %v1184_v2, %v1177_v13  ;;  %v1202_v17 = vmul.f32 %v1189_v4, %v1178_v14  ;;  %v1203_v18 = vmul.f32 %v1194_v9, %v1179_v12  ;;  %v1204_v19 = vmul.f32 %v1199_v10, %v1180_v15  ;;  %v1409_v12 = vpop.permute.xlu1 %1408 }
 0x221   : > { %v1225_v22 = vadd.f32 %v1208_v7, %v1201_v16  ;;  %v1226_v23 = vadd.f32 %v1213_v8, %v1202_v17  ;;  %v1227_v24 = vadd.f32 %v1218_v20, %v1203_v18  ;;  %v1228_v25 = vadd.f32 %v1223_v21, %v1204_v19  ;;  %v1428_v15 = vpop.permute.xlu0 %1427 }
 0x223   : > { %v1229_v26 = vmax.f32 %v1225_v22, 0.0  ;;  %v1230_v27 = vmax.f32 %v1226_v23, 0.0  ;;  %v1231_v28 = vmax.f32 %v1227_v24, 0.0  ;;  %v1232_v29 = vmax.f32 %v1228_v25, 0.0  ;;  %v1433_v16 = vpop.permute.xlu1 %1432 }
 0x225   : > { %v1764_v30 = vpack.c.bf16 %v1230_v27, %v1229_v26  ;;  %v1768_v31 = vpack.c.bf16 %v1232_v29, %v1231_v28  ;;  %v1414_v17 = vpop.permute.xlu0 %1413 }
 0x227   : > { %1765 = vmatprep.subr.bf16.mxu0 %v1764_v30  ;;  %v1419_v18 = vpop.permute.xlu1 %1418 }
 0x228   : > { %1767 = vmatpush3.bf16.msra.mxu0 %v1764_v30 }
 0x229   : > { %1769 = vmatprep.subr.bf16.mxu0 %v1768_v31  ;;  %v1438_v28 = vpop.permute.xlu0 %1437 }
 0x22b   : > { %v1443_v29 = vpop.permute.xlu1 %1442 }
 0x22c   : > { %1771 = vmatpush3.bf16.msra.mxu0 %v1768_v31 }
 0x22d   : > { %1772 = vmatprep.subr.bf16.mxu0 %v1897_v1 }
 0x22f   : > { %1741 = vmatmul.mubr.msk.f32.vlgmr.msra.gmra.mrb[2].mxu0 %vm1269_vm15, %v1234_v32 }
 0x230   : > { %1743 = vmatprep.mubr.msk.f32.mxu0 %vm1269_vm15, %v1235_v33 }
 0x233   : > { %1744 = vmatmul.mubr.msk.f32.gmra.mrb[4].mxu0 %vm1269_vm15, %v1236_v34 }
 0x234   : > { %1754 = vmatprep.mubr.msk.f32.mxu0 %vm1898_vm0, %v1899_v3 }
 0x302   : > { %v1742_v37 = vpop.f32.mrb[2].mxu0 }
 0x303   : > { %v1354_v38 = vadd.f32 %v1742_v37, %v1257_v36  ;;  %v1348_v39 = vpop.f32.mrb[3].mxu0 }
 0x304   : > { %v1349_v40 = vadd.f32 %v1348_v39, %v1252_v35 }
 0x306   : > { %v1367_v41 = vadd.f32 %v1354_v38, %v1349_v40  ;;  %v1745_v42 = vpop.f32.mrb[4].mxu0 }
 0x307   : > { %v1358_v44 = vpop.f32.mrb[5].mxu0  ;;  %v1364_v47 = vadd.f32 %v1745_v42, %v1267_v46 }
 0x308   : > { %v1359_v45 = vadd.f32 %v1358_v44, %v1262_v43 }
 0x30a   : > { %v1368_v48 = vadd.f32 %v1367_v41, %v1359_v45  ;;  %v1458_v41 = vpop.permute.xlu0 %1457 }
 0x30c   : > { %v1369_v49 = vadd.f32 %v1368_v48, %v1364_v47 }
 0x30e   : > { %v1370_v50 = vrot.slane %v1369_v49, 4 }
 0x310   : > { %v1371_v51 = vadd.f32 %v1370_v50, %v1369_v49 }
 0x312   : > { %v1372_v52 = vrot.slane %v1371_v51, 2 }
 0x314   : > { %v1373_v53 = vadd.f32 %v1372_v52, %v1371_v51 }
 0x316   : > { %v1374_v3 = vrot.slane %v1373_v53, 1 }
 0x318   : > { %v1375_v54 = vadd.f32 %v1374_v3, %v1373_v53 }
 0x31a   : > { %v1376_v55 = vmul.f32 0.03125, %v1375_v54 }
 0x31c   : > { %v1377_v56 = vsub.f32 %v1349_v40, %v1376_v55  ;;  %v1378_v57 = vsub.f32 %v1354_v38, %v1376_v55  ;;  %v1379_v58 = vsub.f32 %v1359_v45, %v1376_v55  ;;  %v1380_v59 = vsub.f32 %v1364_v47, %v1376_v55  ;;  %v1453_v40 = vld [vmem:[%s2302_s17] sm:$0xf] }
 0x31e   : > { %v1381_v60 = vmul.f32 %v1377_v56, %v1377_v56  ;;  %v1382_v61 = vmul.f32 %v1378_v57, %v1378_v57  ;;  %v1383_v62 = vmul.f32 %v1379_v58, %v1379_v58  ;;  %v1384_v0 = vmul.f32 %v1380_v59, %v1380_v59 }
 0x320   : > { %v1385_v63 = vadd.f32 %v1382_v61, %v1381_v60 }
 0x322   : > { %v1386_v2 = vadd.f32 %v1385_v63, %v1383_v62 }
 0x324   : > { %v1387_v4 = vadd.f32 %v1386_v2, %v1384_v0 }
 0x326   : > { %v1388_v5 = vrot.slane %v1387_v4, 4 }
 0x328   : > { %v1389_v6 = vadd.f32 %v1388_v5, %v1387_v4 }
 0x32a   : > { %v1390_v7 = vrot.slane %v1389_v6, 2 }
 0x32c   : > { %v1391_v8 = vadd.f32 %v1390_v7, %v1389_v6 }
 0x32e   : > { %v1392_v9 = vrot.slane %v1391_v8, 1 }
 0x330   : > { %v1393_v10 = vadd.f32 %v1392_v9, %v1391_v8 }
 0x332   : > { %v1394_v13 = vmul.f32 0.03125, %v1393_v10 }
 0x334   : > { %v1395_v14 = vadd.f32 1e-05, %v1394_v13 }
 0x336   : > { %1831 = vrsqrt.f32 %v1395_v14 }
 0x340   : > { %v1832_v19 = vpop.eup %1831 }
 0x341   : > { %v1399_v20 = vmul.f32 %v1832_v19, %v1379_v58  ;;  %v1397_v21 = vmul.f32 %v1832_v19, %v1377_v56  ;;  %v1398_v22 = vmul.f32 %v1832_v19, %v1378_v57  ;;  %v1400_v23 = vmul.f32 %v1832_v19, %v1380_v59 }
 0x343   : > { %v1423_v24 = vmul.f32 %v1414_v17, %v1399_v20  ;;  %v1421_v25 = vmul.f32 %v1404_v11, %v1397_v21  ;;  %v1422_v26 = vmul.f32 %v1409_v12, %v1398_v22  ;;  %v1424_v27 = vmul.f32 %v1419_v18, %v1400_v23 }
 0x345   : > { %v1447_v30 = vadd.f32 %v1438_v28, %v1423_v24  ;;  %v1445_v31 = vadd.f32 %v1428_v15, %v1421_v25  ;;  %v1446_v32 = vadd.f32 %v1433_v16, %v1422_v26  ;;  %v1448_v33 = vadd.f32 %v1443_v29, %v1424_v27 }
 0x347   : > { %v1451_v34 = vmax.f32 %v1447_v30, 0.0  ;;  %v1449_v35 = vmax.f32 %v1445_v31, 0.0  ;;  %v1450_v36 = vmax.f32 %v1446_v32, 0.0  ;;  %v1452_v37 = vmax.f32 %v1448_v33, 0.0 }
 0x349   : > { %v1773_v38 = vpack.c.bf16 %v1450_v36, %v1449_v35  ;;  %v1776_v39 = vpack.c.bf16 %v1452_v37, %v1451_v34 }
 0x34b   : > { %1774 = vmatpush3.bf16.msra.mxu0 %v1773_v38 }
 0x34c   : > { %1775 = vmatprep.subr.bf16.mxu0 %v1897_v1 }
 0x34f   : > { %1777 = vmatpush3.bf16.msra.mxu0 %v1776_v39 }
 0x352   : > { %1755 = vmatmul.mubr.msk.f32.vlgmr.msra.gmra.mrb[6].mxu0 %vm1269_vm15, %v1453_v40 }
 0x425   : > { %v1529_v42 = vpop.f32.mrb[6].mxu0 }
 0x426   : > { %v1530_v43 = vadd.f32 %v1529_v42, %v1458_v41  ;;  %v1756_v44 = vpop.f32.mrb[7].mxu0 }
 0x428   : > { %1533 = vst [vmem:[%s624_s27] sm:$0xf] %v1530_v43 }
 0x429   : > { %1846 = shalt.err (!%p1843_p3)
}
 0x42a   : > { %s1847_s22 = scalar_lea.hbm %s2243_s5, 64  ;;  %s1851_s25 = scalar_lea.hbm %s2304_s19, 128 }
 0x42b   : > { %p1848_p4 = scmp.ne.s32.totalorder %s2243_s5, %s1847_s22  ;;  %p1852_p9 = scmp.lt.u32.totalorder %s2243_s5, %s2304_s19 }
 0x42c   : > { %p1853_p10 = scmp.lt.u32.totalorder %s1851_s25, %s1847_s22  ;;  %p1855_p12 = scmp.lt.u32.totalorder %s1847_s22, %s2243_s5 }
 0x42d   : > { %p1849_p7 = pnand %p1848_p4, %p2042_p5 }
 0x42e   : > { %p1854_p11 = por %p1853_p10, %p1852_p9 }
 0x42f   : > { %p1850_p8 = pneg %p1849_p7 }
 0x430   : > { %p1856_p13 = por %p1855_p12, %p1854_p11 }
 0x432   : > { %p1857_p0 = pnand %p1856_p13, %p1850_p8 }
 0x434   : > { %1860 = shalt.err (!%p1857_p0)
}
 0x435   : > { %1782 = dma.vmem_to_hbm [thread:$0]  (%p2042_p5), %s2245_s28, 64, %s2243_s5, %s1535_s20  }
 0x436 PF: > { %p1788_p1 = scmp.ge.s32.totalorder %s1895_s21, 2  ;;  %s1560_s2 = sand.u32 1, %s1883_s0  }
 0x437   : > { %s1561_s29 = scalar_lea.sflag [#allocation3], %s1560_s2 }
 0x438   : > { %p1785_p2 = pnand %p1788_p1, %p2046_p6 }
 0x43a   : > { %1878 = dma.done.wait (!%p1785_p2), %s1561_s29, 64  }
 0x43b   : > { %1880 = vsyncadd (!%p1785_p2), %s1561_s29, 4294967232  ;;  %s2325_s21 = sld [smem:[#allocation6_spill]]  ;;  %s2326_s23 = sld [smem:[#allocation5_spill]] }
 0x43c   : > { %s2327_s20 = sld [smem:[#allocation7_spill]]  ;;  %s2328_s0 = smov %s1887_s30 }
 0x441   : > { %p29_p3 = scmp.ge.s32.totalorder %s2325_s21, 4   ;;  %s2329_s30 = smov %s2326_s23 }
 0x443   :  { %31 = sbr.rel (!%p29_p3) target bundleno = 10 (0xa), region = 140 }
 0x44a   :  { %1566 = vsyncpa [#allocation3], 1 }
 0x44b   :  { %1568 = vsyncpa [#allocation3 + $0x1], 1 }

</bundles_post_ra>
